<compile_context>
chip_gen: v6e
topology: v6e:2x2x1
jax: 0.10.0
libtpu: 0.0.40
codegen_flags: <defaults>
</compile_context>

<pallas_src>
import jax
import jax.numpy as jnp
from jax.experimental import pallas as pl
from jax.experimental.pallas import tpu as pltpu


# --------------------------------------------------------------------------- #
# helpers
# --------------------------------------------------------------------------- #
def _vmem_budget():
    """Generation-aware scoped-VMEM budget: ~half of physical VMEM, capped at 64 MiB."""
    default = 32 * 1024 * 1024
    try:
        cap = int(pltpu.get_tpu_info().vmem_capacity_bytes)
        return max(default, min(cap // 2, 64 * 1024 * 1024))
    except Exception:  # non-TPU tracing / older API -> safe lowest common denominator
        return default


def _resident_spec(shape):
    """VMEM-resident (constant index_map) spec; single-buffered when supported."""
    index_map = lambda *_: (0,) * len(shape)
    try:
        return pl.BlockSpec(shape, index_map, pipeline_mode=pl.Buffered(1))
    except (TypeError, AttributeError):
        return pl.BlockSpec(shape, index_map)


def _pick_spatial_tile(C, S, *, budget_bytes, n_stream_blocks, target_bytes=1 << 20):
    """Lane tile (multiple of 128) aiming at ~target_bytes per streamed block while
    keeping `n_stream_blocks` double-buffered blocks inside `budget_bytes`."""
    bytes_per_lane = C * 4
    ts = target_bytes // bytes_per_lane
    ts = min(ts, max(128, budget_bytes // (2 * n_stream_blocks * bytes_per_lane)))
    s_ceil = ((S + 127) // 128) * 128
    ts = min(ts, s_ceil)
    return max(128, (ts // 128) * 128)


# --------------------------------------------------------------------------- #
# kernels
# --------------------------------------------------------------------------- #
def _make_fused_kernel(C, S, ts):
    def kernel(rgb_ref, dep_ref, w1_ref, w2_ref, o_ref,
               dep_store, acc_rgb, acc_dep, gate_sc):
        # rgb/dep/o: (1, C, ts)   w1: (2C, 2C)   w2: (2C, C)
        # dep_store: (1, C, n_s*ts)  acc_*: (1, C)  gate_sc: (1, C, 1)
        p = pl.program_id(1)
        s = pl.program_id(2)
        start = pl.multiple_of(s * ts, 128)

        @pl.when((p == 0) & (s == 0))
        def _init():
            acc_rgb[...] = jnp.full(acc_rgb.shape, -jnp.inf, acc_rgb.dtype)
            acc_dep[...] = jnp.full(acc_dep.shape, -jnp.inf, acc_dep.dtype)

        @pl.when(p == 0)
        def _stream():
            # Mask the ragged last tile so pad lanes never reach the max.
            lane = jax.lax.broadcasted_iota(jnp.int32, (1, C, ts), 2)
            valid = lane < (S - s * ts)
            r = jnp.where(valid, rgb_ref[...], -jnp.inf)
            d = jnp.where(valid, dep_ref[...], -jnp.inf)
            acc_rgb[...] = jnp.maximum(acc_rgb[...], jnp.max(r, axis=-1))
            acc_dep[...] = jnp.maximum(acc_dep[...], jnp.max(d, axis=-1))
            # Keep depth resident in VMEM: phase 1 never re-reads it from HBM.
            dep_store[:, :, pl.ds(start, ts)] = dep_ref[...]

        @pl.when((p == 1) & (s == 0))
        def _gate():
            # pooled = [max(rgb); max(depth)]; split fc1's weight by input rows
            # (first C rows see rgb, last C see depth) instead of a lane concat.
            h = (jnp.dot(acc_rgb[...], w1_ref[:C, :], preferred_element_type=jnp.float32)
                 + jnp.dot(acc_dep[...], w1_ref[C:, :], preferred_element_type=jnp.float32))
            h = jnp.maximum(h, 0.0)                                          # ReLU
            z = jnp.dot(h, w2_ref[...], preferred_element_type=jnp.float32)  # fc2
            gate_sc[...] = jax.nn.sigmoid(z)[:, :, None]

        @pl.when(p == 1)
        def _write():
            o_ref[...] = (dep_store[:, :, pl.ds(start, ts)]
                          * gate_sc[...]).astype(o_ref.dtype)

    return kernel


def _make_gate_kernel(C, S, ts):
    def kernel(rgb_ref, dep_ref, w1_ref, w2_ref, gate_ref, acc_rgb, acc_dep):
        s = pl.program_id(1)

        @pl.when(s == 0)
        def _init():
            acc_rgb[...] = jnp.full(acc_rgb.shape, -jnp.inf, acc_rgb.dtype)
            acc_dep[...] = jnp.full(acc_dep.shape, -jnp.inf, acc_dep.dtype)

        lane = jax.lax.broadcasted_iota(jnp.int32, (1, C, ts), 2)
        valid = lane < (S - s * ts)
        r = jnp.where(valid, rgb_ref[...], -jnp.inf)
        d = jnp.where(valid, dep_ref[...], -jnp.inf)
        acc_rgb[...] = jnp.maximum(acc_rgb[...], jnp.max(r, axis=-1))
        acc_dep[...] = jnp.maximum(acc_dep[...], jnp.max(d, axis=-1))

        @pl.when(s == pl.num_programs(1) - 1)
        def _finalize():
            h = (jnp.dot(acc_rgb[...], w1_ref[:C, :], preferred_element_type=jnp.float32)
                 + jnp.dot(acc_dep[...], w1_ref[C:, :], preferred_element_type=jnp.float32))
            h = jnp.maximum(h, 0.0)
            z = jnp.dot(h, w2_ref[...], preferred_element_type=jnp.float32)
            gate_ref[...] = jax.nn.sigmoid(z)[:, :, None].astype(gate_ref.dtype)

    return kernel


def _modulate_kernel(dep_ref, gate_ref, o_ref):
    # dep/o: (1, C, ts)   gate: (1, C, 1)
    o_ref[...] = (dep_ref[...] * gate_ref[...]).astype(o_ref.dtype)


# --------------------------------------------------------------------------- #
# wrapper
# --------------------------------------------------------------------------- #
def ca_enhance(rgb, depth, w1, w2, *, spatial_tile=None, force_two_pass=False):
    """rgb, depth: (B, C, H, W) f32.  w1: (2C, 2C), w2: (2C, C), stored pre-transposed
    as (in_features, out_features), no bias.  Returns depth * gate, shape (B, C, H, W)."""
    assert rgb.shape == depth.shape
    B, C, H, W = depth.shape
    assert w1.shape == (2 * C, 2 * C) and w2.shape == (2 * C, C)
    S = H * W
    if spatial_tile is not None:
        assert spatial_tile >= 128 and spatial_tile % 128 == 0

    rgb_flat = rgb.reshape(B, C, S)
    dep_flat = depth.reshape(B, C, S)

    budget = _vmem_budget()
    weight_bytes = (w1.size + w2.size) * 4
    slack = 2 * 1024 * 1024  # accumulators, gate scratch, compiler internals

    w1_spec = _resident_spec((2 * C, 2 * C))
    w2_spec = _resident_spec((2 * C, C))

    # ---------- fused single-pass path: per-batch depth stays resident in VMEM ----------
    if not force_two_pass:
        avail = budget - weight_bytes - slack - C * S * 4
        if avail >= 3 * 2 * C * 128 * 4:
            ts = spatial_tile or _pick_spatial_tile(
                C, S, budget_bytes=avail, n_stream_blocks=3)
            n_s = pl.cdiv(S, ts)
            s_pad = n_s * ts
            total = (weight_bytes + slack
                     + C * s_pad * 4          # resident depth scratch
                     + 3 * 2 * C * ts * 4)    # rgb/dep/out double-buffered blocks
            if total <= budget:
                stream_map = lambda b, p, s: (b, 0, s * (1 - p) + (n_s - 1) * p)
                out = pl.pallas_call(
                    _make_fused_kernel(C, S, ts),
                    out_shape=jax.ShapeDtypeStruct((B, C, S), jnp.float32),
                    grid_spec=pltpu.PrefetchScalarGridSpec(
                        num_scalar_prefetch=0,
                        grid=(B, 2, n_s),   # batch, phase (stream / write), spatial tiles
                        in_specs=[
                            pl.BlockSpec((1, C, ts), stream_map),
                            pl.BlockSpec((1, C, ts), stream_map),
                            w1_spec,
                            w2_spec,
                        ],
                        # Phase 0 keeps the output on block (b,0,0) (never flushed until
                        # phase 1 writes it); phase 1 walks the spatial blocks.
                        out_specs=pl.BlockSpec((1, C, ts), lambda b, p, s: (b, 0, s * p)),
                        scratch_shapes=[
                            pltpu.VMEM((1, C, s_pad), jnp.float32),   # resident depth
                            pltpu.VMEM((1, C), jnp.float32),          # rgb max acc
                            pltpu.VMEM((1, C), jnp.float32),          # depth max acc
                            pltpu.VMEM((1, C, 1), jnp.float32),       # gate
                        ],
                    ),
                    compiler_params=pltpu.CompilerParams(
                        dimension_semantics=("parallel", "arbitrary", "arbitrary"),
                        vmem_limit_bytes=budget,
                    ),
                    cost_estimate=pl.CostEstimate(
                        flops=B * (2 * (2 * C) * (2 * C) + 2 * (2 * C) * C + C * S),
                        transcendentals=B * C,
                        bytes_accessed=(3 * B * C * S + w1.size + w2.size) * 4,
                    ),
                )(rgb_flat, dep_flat, w1, w2)
                return out.reshape(B, C, H, W)

    # ---------- fallback: two streaming passes (gate, then modulate) ----------
    ts_g = spatial_tile or _pick_spatial_tile(
        C, S, budget_bytes=budget - weight_bytes - slack, n_stream_blocks=2)
    n_g = pl.cdiv(S, ts_g)
    gate = pl.pallas_call(
        _make_gate_kernel(C, S, ts_g),
        out_shape=jax.ShapeDtypeStruct((B, C, 1), jnp.float32),
        grid_spec=pltpu.PrefetchScalarGridSpec(
            num_scalar_prefetch=0,
            grid=(B, n_g),
            in_specs=[
                pl.BlockSpec((1, C, ts_g), lambda b, s: (b, 0, s)),
                pl.BlockSpec((1, C, ts_g), lambda b, s: (b, 0, s)),
                w1_spec,
                w2_spec,
            ],
            out_specs=pl.BlockSpec((1, C, 1), lambda b, s: (b, 0, 0)),
            scratch_shapes=[
                pltpu.VMEM((1, C), jnp.float32),
                pltpu.VMEM((1, C), jnp.float32),
            ],
        ),
        compiler_params=pltpu.CompilerParams(
            dimension_semantics=("parallel", "arbitrary"),
            vmem_limit_bytes=budget,
        ),
        cost_estimate=pl.CostEstimate(
            flops=B * (2 * (2 * C) * (2 * C) + 2 * (2 * C) * C),
            transcendentals=B * C,
            bytes_accessed=(2 * B * C * S + w1.size + w2.size + B * C) * 4,
        ),
    )(rgb_flat, dep_flat, w1, w2)

    # Modulate pass holds only depth + out, so it can afford a larger tile.
    ts_m = spatial_tile or _pick_spatial_tile(
        C, S, budget_bytes=budget - slack, n_stream_blocks=2, target_bytes=2 << 20)
    n_m = pl.cdiv(S, ts_m)
    out = pl.pallas_call(
        _modulate_kernel,
        out_shape=jax.ShapeDtypeStruct((B, C, S), jnp.float32),
        grid_spec=pltpu.PrefetchScalarGridSpec(
            num_scalar_prefetch=0,
            grid=(B, n_m),
            in_specs=[
                pl.BlockSpec((1, C, ts_m), lambda b, s: (b, 0, s)),
                pl.BlockSpec((1, C, 1), lambda b, s: (b, 0, 0)),
            ],
            out_specs=pl.BlockSpec((1, C, ts_m), lambda b, s: (b, 0, s)),
        ),
        compiler_params=pltpu.CompilerParams(
            dimension_semantics=("parallel", "parallel"),
            vmem_limit_bytes=budget,
        ),
        cost_estimate=pl.CostEstimate(
            flops=B * C * S,
            transcendentals=0,
            bytes_accessed=(2 * B * C * S + B * C) * 4,
        ),
    )(dep_flat, gate)
    return out.reshape(B, C, H, W)


# --------------------------------------------------------------------------- #
# params / reference / test
# --------------------------------------------------------------------------- #
def init_params(key, in_planes):
    """Conv2d 1x1 (bias=False) weights, stored pre-transposed as (in, out)."""
    k1, k2 = jax.random.split(key)
    bound = 1.0 / (in_planes ** 0.5)
    w1 = jax.random.uniform(k1, (in_planes, in_planes), jnp.float32, -bound, bound)
    w2 = jax.random.uniform(k2, (in_planes, in_planes // 2), jnp.float32, -bound, bound)
    return w1, w2


def reference(rgb, depth, w1, w2):
    """Pure-JAX reference mirroring the PyTorch forward."""
    x = jnp.concatenate([rgb, depth], axis=1)      # (B, 2C, H, W)
    pooled = jnp.max(x, axis=(2, 3))               # global max pool -> (B, 2C)
    h = jnp.maximum(pooled @ w1, 0.0)
    gate = jax.nn.sigmoid(h @ w2)                  # (B, C)
    return depth * gate[:, :, None, None]


if __name__ == "__main__":
    key = jax.random.PRNGKey(0)
    kr, kd, kp = jax.random.split(key, 3)

    # Small shapes; H*W = 324 is deliberately NOT a multiple of 128, so the
    # masked ragged-tile path is exercised.
    B, C, H, W = 2, 4, 18, 18          # per-stream channels C; in_planes = 2*C
    rgb = jax.random.normal(kr, (B, C, H, W), jnp.float32)
    depth = jax.random.normal(kd, (B, C, H, W), jnp.float32)
    w1, w2 = init_params(kp, 2 * C)

    ref = reference(rgb, depth, w1, w2)

    # Fused path, forced to 3 spatial tiles (multi-tile max accumulation,
    # resident-depth phase-1 writes, masked last tile).
    out = jax.block_until_ready(ca_enhance(rgb, depth, w1, w2, spatial_tile=128))
    assert out.shape == (B, C, H, W), out.shape
    assert jnp.allclose(out, ref, atol=1e-5, rtol=1e-5), "fused (tiled) mismatch"

    # Fused path with auto (byte-target) tile sizing: single ragged tile per batch.
    out_auto = jax.block_until_ready(ca_enhance(rgb, depth, w1, w2))
    assert jnp.allclose(out_auto, ref, atol=1e-5, rtol=1e-5), "fused (auto) mismatch"

    # Two-pass fallback (the path used when per-batch depth does not fit in VMEM).
    out_two = jax.block_until_ready(
        ca_enhance(rgb, depth, w1, w2, spatial_tile=128, force_two_pass=True))
    assert jnp.allclose(out_two, ref, atol=1e-5, rtol=1e-5), "two-pass mismatch"

    print("KERNEL_OK")
</pallas_src>

<mosaic_0001>
module attributes {stable_mosaic.version = 11 : i64} {
  func.func @kernel(%arg0: i32, %arg1: i32, %arg2: i32, %arg3: memref<1x4x128xf32, #tpu.memory_space<vmem>>, %arg4: memref<1x4x128xf32, #tpu.memory_space<vmem>>, %arg5: memref<8x8xf32, #tpu.memory_space<vmem>>, %arg6: memref<8x4xf32, #tpu.memory_space<vmem>>, %arg7: memref<1x4x128xf32, #tpu.memory_space<vmem>>, %arg8: memref<1x4x384xf32, #tpu.memory_space<vmem>>, %arg9: memref<1x4xf32, #tpu.memory_space<vmem>>, %arg10: memref<1x4xf32, #tpu.memory_space<vmem>>, %arg11: memref<1x4x1xf32, #tpu.memory_space<vmem>>) attributes {dimension_semantics = [#tpu.dimension_semantics<parallel>, #tpu.dimension_semantics<arbitrary>, #tpu.dimension_semantics<arbitrary>], iteration_bounds = array<i64: 2, 2, 3>, scalar_prefetch = 0 : i64, scratch_operands = 4 : i64, tpu.core_type = #tpu.core_type<tc>, window_params = [{transform_indices = @transform_0, window_bounds = array<i64: 1, 4, 128>}, {transform_indices = @transform_1, window_bounds = array<i64: 1, 4, 128>}, {pipeline_mode = #tpu.pipeline_mode<synchronous>, transform_indices = @transform_2, window_bounds = array<i64: 8, 8>}, {pipeline_mode = #tpu.pipeline_mode<synchronous>, transform_indices = @transform_3, window_bounds = array<i64: 8, 4>}, {transform_indices = @transform_4, window_bounds = array<i64: 1, 4, 128>}]} {
    %c128_i32 = arith.constant 128 : i32
    %0 = arith.muli %arg2, %c128_i32 : i32
    %1 = tpu.assume_multiple %0, 128 : i32
    %c0_i32 = arith.constant 0 : i32
    %2 = arith.cmpi eq, %arg1, %c0_i32 : i32
    %c0_i32_0 = arith.constant 0 : i32
    %3 = arith.cmpi eq, %arg2, %c0_i32_0 : i32
    %4 = arith.andi %2, %3 : i1
    %5 = arith.extui %4 : i1 to i32
    %c0_i32_1 = arith.constant 0 : i32
    %6 = arith.cmpi ne, %5, %c0_i32_1 : i32
    scf.if %6 {
      %cst = arith.constant 0xFF800000 : f32
      %18 = vector.broadcast %cst : f32 to vector<1x4xf32>
      %c0 = arith.constant 0 : index
      %c0_8 = arith.constant 0 : index
      %19 = vector.load %arg9[%c0, %c0_8] : memref<1x4xf32, #tpu.memory_space<vmem>>, vector<1x4xf32>
      tpu.vector_store %arg9[%c0, %c0_8], %18 {strides = array<i32>} : memref<1x4xf32, #tpu.memory_space<vmem>>, vector<1x4xf32>,
      %cst_9 = arith.constant 0xFF800000 : f32
      %20 = vector.broadcast %cst_9 : f32 to vector<1x4xf32>
      %c0_10 = arith.constant 0 : index
      %c0_11 = arith.constant 0 : index
      %21 = vector.load %arg10[%c0_10, %c0_11] : memref<1x4xf32, #tpu.memory_space<vmem>>, vector<1x4xf32>
      tpu.vector_store %arg10[%c0_10, %c0_11], %20 {strides = array<i32>} : memref<1x4xf32, #tpu.memory_space<vmem>>, vector<1x4xf32>,
    } else {
    }
    %c0_i32_2 = arith.constant 0 : i32
    %7 = arith.cmpi eq, %arg1, %c0_i32_2 : i32
    %8 = arith.extui %7 : i1 to i32
    %c0_i32_3 = arith.constant 0 : i32
    %9 = arith.cmpi ne, %8, %c0_i32_3 : i32
    scf.if %9 {
      %18 = tpu.iota {dimensions = array<i32: 2>} : vector<1x4x128xi32>
      %c128_i32_8 = arith.constant 128 : i32
      %19 = arith.muli %arg2, %c128_i32_8 : i32
      %c324_i32 = arith.constant 324 : i32
      %20 = arith.subi %c324_i32, %19 : i32
      %21 = vector.broadcast %20 : i32 to vector<1x4x128xi32>
      %22 = arith.cmpi slt, %18, %21 : vector<1x4x128xi32>
      %c0 = arith.constant 0 : index
      %c0_9 = arith.constant 0 : index
      %c0_10 = arith.constant 0 : index
      %23 = vector.load %arg3[%c0, %c0_9, %c0_10] : memref<1x4x128xf32, #tpu.memory_space<vmem>>, vector<1x4x128xf32>
      %cst = arith.constant 0xFF800000 : f32
      %24 = vector.broadcast %cst : f32 to vector<1x4x128xf32>
      %25 = arith.select %22, %23, %24 : vector<1x4x128xi1>, vector<1x4x128xf32>
      %c0_11 = arith.constant 0 : index
      %c0_12 = arith.constant 0 : index
      %c0_13 = arith.constant 0 : index
      %26 = vector.load %arg4[%c0_11, %c0_12, %c0_13] : memref<1x4x128xf32, #tpu.memory_space<vmem>>, vector<1x4x128xf32>
      %cst_14 = arith.constant 0xFF800000 : f32
      %27 = vector.broadcast %cst_14 : f32 to vector<1x4x128xf32>
      %28 = arith.select %22, %26, %27 : vector<1x4x128xi1>, vector<1x4x128xf32>
      %c0_15 = arith.constant 0 : index
      %c0_16 = arith.constant 0 : index
      %29 = vector.load %arg9[%c0_15, %c0_16] : memref<1x4xf32, #tpu.memory_space<vmem>>, vector<1x4xf32>
      %cst_17 = arith.constant dense<0xFF800000> : vector<1x4xf32>
      %30 = vector.multi_reduction <maximumf>, %25, %cst_17 [2] : vector<1x4x128xf32> to vector<1x4xf32>
      %31 = arith.maximumf %29, %30 : vector<1x4xf32>
      %c0_18 = arith.constant 0 : index
      %c0_19 = arith.constant 0 : index
      %32 = vector.load %arg9[%c0_18, %c0_19] : memref<1x4xf32, #tpu.memory_space<vmem>>, vector<1x4xf32>
      tpu.vector_store %arg9[%c0_18, %c0_19], %31 {strides = array<i32>} : memref<1x4xf32, #tpu.memory_space<vmem>>, vector<1x4xf32>,
      %c0_20 = arith.constant 0 : index
      %c0_21 = arith.constant 0 : index
      %33 = vector.load %arg10[%c0_20, %c0_21] : memref<1x4xf32, #tpu.memory_space<vmem>>, vector<1x4xf32>
      %cst_22 = arith.constant dense<0xFF800000> : vector<1x4xf32>
      %34 = vector.multi_reduction <maximumf>, %28, %cst_22 [2] : vector<1x4x128xf32> to vector<1x4xf32>
      %35 = arith.maximumf %33, %34 : vector<1x4xf32>
      %c0_23 = arith.constant 0 : index
      %c0_24 = arith.constant 0 : index
      %36 = vector.load %arg10[%c0_23, %c0_24] : memref<1x4xf32, #tpu.memory_space<vmem>>, vector<1x4xf32>
      tpu.vector_store %arg10[%c0_23, %c0_24], %35 {strides = array<i32>} : memref<1x4xf32, #tpu.memory_space<vmem>>, vector<1x4xf32>,
      %c0_25 = arith.constant 0 : index
      %c0_26 = arith.constant 0 : index
      %c0_27 = arith.constant 0 : index
      %37 = vector.load %arg4[%c0_25, %c0_26, %c0_27] : memref<1x4x128xf32, #tpu.memory_space<vmem>>, vector<1x4x128xf32>
      %c0_28 = arith.constant 0 : index
      %c0_29 = arith.constant 0 : index
      %38 = arith.index_cast %1 : i32 to index
      %39 = vector.load %arg8[%c0_28, %c0_29, %38] : memref<1x4x384xf32, #tpu.memory_space<vmem>>, vector<1x4x128xf32>
      tpu.vector_store %arg8[%c0_28, %c0_29, %38], %37 {strides = array<i32>} : memref<1x4x384xf32, #tpu.memory_space<vmem>>, vector<1x4x128xf32>,
    } else {
    }
    %c1_i32 = arith.constant 1 : i32
    %10 = arith.cmpi eq, %arg1, %c1_i32 : i32
    %c0_i32_4 = arith.constant 0 : i32
    %11 = arith.cmpi eq, %arg2, %c0_i32_4 : i32
    %12 = arith.andi %10, %11 : i1
    %13 = arith.extui %12 : i1 to i32
    %c0_i32_5 = arith.constant 0 : i32
    %14 = arith.cmpi ne, %13, %c0_i32_5 : i32
    scf.if %14 {
      %c0 = arith.constant 0 : index
      %c0_8 = arith.constant 0 : index
      %18 = vector.load %arg9[%c0, %c0_8] : memref<1x4xf32, #tpu.memory_space<vmem>>, vector<1x4xf32>
      %c0_9 = arith.constant 0 : index
      %c0_10 = arith.constant 0 : index
      %19 = vector.load %arg5[%c0_9, %c0_10] : memref<8x8xf32, #tpu.memory_space<vmem>>, vector<4x8xf32>
      %cst = arith.constant dense<0.000000e+00> : vector<1x8xf32>
      %20 = tpu.matmul %18, %19, %cst {dimension_numbers = #tpu.dot_dimension_numbers<[1], [0], [0], [1], [0, 0, 1, 1], [], []>} : vector<1x4xf32>, vector<4x8xf32>, vector<1x8xf32> -> vector<1x8xf32>
      %c0_11 = arith.constant 0 : index
      %c0_12 = arith.constant 0 : index
      %21 = vector.load %arg10[%c0_11, %c0_12] : memref<1x4xf32, #tpu.memory_space<vmem>>, vector<1x4xf32>
      %c4 = arith.constant 4 : index
      %c0_13 = arith.constant 0 : index
      %22 = vector.load %arg5[%c4, %c0_13] : memref<8x8xf32, #tpu.memory_space<vmem>>, vector<4x8xf32>
      %cst_14 = arith.constant dense<0.000000e+00> : vector<1x8xf32>
      %23 = tpu.matmul %21, %22, %cst_14 {dimension_numbers = #tpu.dot_dimension_numbers<[1], [0], [0], [1], [0, 0, 1, 1], [], []>} : vector<1x4xf32>, vector<4x8xf32>, vector<1x8xf32> -> vector<1x8xf32>
      %24 = arith.addf %20, %23 : vector<1x8xf32>
      %cst_15 = arith.constant 0.000000e+00 : f32
      %25 = vector.broadcast %cst_15 : f32 to vector<1x8xf32>
      %26 = arith.maximumf %24, %25 : vector<1x8xf32>
      %c0_16 = arith.constant 0 : index
      %c0_17 = arith.constant 0 : index
      %27 = vector.load %arg6[%c0_16, %c0_17] : memref<8x4xf32, #tpu.memory_space<vmem>>, vector<8x4xf32>
      %cst_18 = arith.constant dense<0.000000e+00> : vector<1x4xf32>
      %28 = tpu.matmul %26, %27, %cst_18 {dimension_numbers = #tpu.dot_dimension_numbers<[1], [0], [0], [1], [0, 0, 1, 1], [], []>} : vector<1x8xf32>, vector<8x4xf32>, vector<1x4xf32> -> vector<1x4xf32>
      %29 = arith.negf %28 : vector<1x4xf32>
      %30 = math.exp %29 : vector<1x4xf32>
      %cst_19 = arith.constant 1.000000e+00 : f32
      %31 = vector.broadcast %cst_19 : f32 to vector<1x4xf32>
      %32 = arith.addf %31, %30 : vector<1x4xf32>
      %33 = arith.divf %31, %32 : vector<1x4xf32>
      %34 = vector.shape_cast %33 : vector<1x4xf32> to vector<1x4x1xf32>
      %c0_20 = arith.constant 0 : index
      %c0_21 = arith.constant 0 : index
      %c0_22 = arith.constant 0 : index
      %35 = vector.load %arg11[%c0_20, %c0_21, %c0_22] : memref<1x4x1xf32, #tpu.memory_space<vmem>>, vector<1x4x1xf32>
      tpu.vector_store %arg11[%c0_20, %c0_21, %c0_22], %34 {strides = array<i32>} : memref<1x4x1xf32, #tpu.memory_space<vmem>>, vector<1x4x1xf32>,
    } else {
    }
    %c1_i32_6 = arith.constant 1 : i32
    %15 = arith.cmpi eq, %arg1, %c1_i32_6 : i32
    %16 = arith.extui %15 : i1 to i32
    %c0_i32_7 = arith.constant 0 : i32
    %17 = arith.cmpi ne, %16, %c0_i32_7 : i32
    scf.if %17 {
      %c0 = arith.constant 0 : index
      %c0_8 = arith.constant 0 : index
      %18 = arith.index_cast %1 : i32 to index
      %19 = vector.load %arg8[%c0, %c0_8, %18] : memref<1x4x384xf32, #tpu.memory_space<vmem>>, vector<1x4x128xf32>
      %c0_9 = arith.constant 0 : index
      %c0_10 = arith.constant 0 : index
      %c0_11 = arith.constant 0 : index
      %20 = vector.load %arg11[%c0_9, %c0_10, %c0_11] : memref<1x4x1xf32, #tpu.memory_space<vmem>>, vector<1x4x1xf32>
      %21 = vector.broadcast %20 : vector<1x4x1xf32> to vector<1x4x128xf32>
      %22 = arith.mulf %19, %21 : vector<1x4x128xf32>
      %c0_12 = arith.constant 0 : index
      %c0_13 = arith.constant 0 : index
      %c0_14 = arith.constant 0 : index
      %23 = vector.load %arg7[%c0_12, %c0_13, %c0_14] : memref<1x4x128xf32, #tpu.memory_space<vmem>>, vector<1x4x128xf32>
      tpu.vector_store %arg7[%c0_12, %c0_13, %c0_14], %22 {strides = array<i32>} : memref<1x4x128xf32, #tpu.memory_space<vmem>>, vector<1x4x128xf32>,
    } else {
    }
    return
  }
  func.func @transform_0(%arg0: i32, %arg1: i32, %arg2: i32) -> (i32, i32, i32) {
    %c1_i32 = arith.constant 1 : i32
    %0 = arith.subi %c1_i32, %arg1 : i32
    %1 = arith.muli %arg2, %0 : i32
    %c2_i32 = arith.constant 2 : i32
    %2 = arith.muli %c2_i32, %arg1 : i32
    %3 = arith.addi %1, %2 : i32
    %c0_i32 = arith.constant 0 : i32
    %c0_i32_0 = arith.constant 0 : i32
    return %arg0, %c0_i32, %3 : i32, i32, i32
  }
  func.func @transform_1(%arg0: i32, %arg1: i32, %arg2: i32) -> (i32, i32, i32) {
    %c1_i32 = arith.constant 1 : i32
    %0 = arith.subi %c1_i32, %arg1 : i32
    %1 = arith.muli %arg2, %0 : i32
    %c2_i32 = arith.constant 2 : i32
    %2 = arith.muli %c2_i32, %arg1 : i32
    %3 = arith.addi %1, %2 : i32
    %c0_i32 = arith.constant 0 : i32
    %c0_i32_0 = arith.constant 0 : i32
    return %arg0, %c0_i32, %3 : i32, i32, i32
  }
  func.func @transform_2(%arg0: i32, %arg1: i32, %arg2: i32) -> (i32, i32) {
    %c0_i32 = arith.constant 0 : i32
    %c0_i32_0 = arith.constant 0 : i32
    %c0_i32_1 = arith.constant 0 : i32
    return %c0_i32, %c0_i32_0 : i32, i32
  }
  func.func @transform_3(%arg0: i32, %arg1: i32, %arg2: i32) -> (i32, i32) {
    %c0_i32 = arith.constant 0 : i32
    %c0_i32_0 = arith.constant 0 : i32
    %c0_i32_1 = arith.constant 0 : i32
    return %c0_i32, %c0_i32_0 : i32, i32
  }
  func.func @transform_4(%arg0: i32, %arg1: i32, %arg2: i32) -> (i32, i32, i32) {
    %0 = arith.muli %arg2, %arg1 : i32
    %c0_i32 = arith.constant 0 : i32
    %c0_i32_0 = arith.constant 0 : i32
    return %arg0, %c0_i32, %0 : i32, i32, i32
  }
}

</mosaic_0001>

<bundles_post_ra>
// kernel: tpu_custom_call.1
= control target key start
LH: loop header
LB: loop body
LE: loop exit
PB: predicated region body
PF: predicated region fallthrough
CT: control target
= control target key end

     0   :  { %s1628_s0 = inlined_call_operand.hbm [shape: f32[2,4,324], index: 0, kind: input, shape index: {}]   ;;  %s1629_s1 = inlined_call_operand.hbm [shape: f32[2,4,324], index: 1, kind: input, shape index: {}]   ;;  %s1630_s2 = inlined_call_operand.vmem [shape: f32[8,8], index: 2, kind: input, shape index: {}]   ;;  %s1631_s3 = inlined_call_operand.vmem [shape: f32[8,4], index: 3, kind: input, shape index: {}]   ;;  %s1632_s4 = inlined_call_operand.hbm [shape: f32[2,4,324], index: 4, kind: output, shape index: {}]  }
   0x1   :  { %1641 = sst [smem:[#allocation21_spill]] %s1628_s0 }
   0x2   :  { %1642 = sst [smem:[#allocation22_spill]] %s1629_s1 }
   0x3   :  { %1643 = sst [smem:[#allocation23_spill]] %s1630_s2 }
   0x4   :  { %1644 = sst [smem:[#allocation24_spill]] %s1631_s3 }
   0x5   :  { %1645 = sst [smem:[#allocation25_spill]] %s1632_s4 }
   0x6   :  { %9 = vsyncpa [#allocation7], 0 }
   0x7   :  { %11 = vsyncpa [#allocation7 + $0x1], 0 }
   0x8   :  { %12 = vsyncpa [#allocation10], 0 }
   0x9   :  { %14 = vsyncpa [#allocation10 + $0x1], 0 }
   0xa   :  { %15 = vsyncpa [#allocation8], 0 }
   0xb   :  { %17 = vsyncpa [#allocation8 + $0x1], 0  ;;  %s1318_s15 = smov 0   ;;  %s1320_s16 = smov 0  }
   0xc   :  { %s1322_s17 = smov 0   ;;  %s1324_s18 = smov 0  }
   0xd   :  { %s1326_s19 = smov 0   ;;  %s1328_s20 = smov 0  }
   0xe   :  { %s1330_s21 = smov 0   ;;  %s1332_s22 = smov 0  }
   0xf   :  { %s1334_s23 = smov 0   ;;  %s1336_s24 = smov 0  }
  0x10   :  { %s1338_s25 = smov 0   ;;  %s1340_s26 = smov 0  }
  0x11   :  { %s1342_s27 = smov 0  }
  0x12 LB: > { %1646 = sst [smem:[#allocation15_spill]] %s1266_s23  ;;  %s893_s28 = sadd.s32 4294967295, %s1282_s27   ;;  %s1282_s27 = sphi %s1342_s27, %s23_s27   ;;  %s1278_s26 = sphi %s1340_s26, %s1675_s26   ;;  %s1274_s25 = sphi %s1338_s25, %s1674_s25   ;;  %s1270_s24 = sphi %s1336_s24, %s1683_s24   ;;  %s1266_s23 = sphi %s1334_s23, %s1672_s23   ;;  %s1262_s22 = sphi %s1332_s22, %s1671_s22   ;;  %s1258_s21 = sphi %s1330_s21, %s1682_s21   ;;  %s1254_s20 = sphi %s1328_s20, %s1681_s20   ;;  %s1250_s19 = sphi %s1326_s19, %s1680_s19   ;;  %s1246_s18 = sphi %s1324_s18, %s1679_s18   ;;  %s1242_s17 = sphi %s1322_s17, %s1678_s17   ;;  %s1238_s16 = sphi %s1320_s16, %s1677_s16   ;;  %s1234_s15 = sphi %s1318_s15, %s1676_s15  }
  0x13   : > { %1647 = sst [smem:[#allocation16_spill]] %s1274_s25  ;;  %s35_s30 = sadd.s32 1, %s1270_s24 }
  0x14   : > { %1648 = sst [smem:[#allocation17_spill]] %s1278_s26  ;;  %s38_s5 = sadd.s32 1, %s1274_s25 }
  0x15   : > { %p36_p0 = scmp.ge.s32.totalorder %s35_s30, 3  ;;  %s42_s6 = sadd.s32 1, %s1278_s26 }
  0x16   : > { %s46_s7 = ssub.s32 1, %s1274_s25  ;;  %s895_s8 = sshll.u32 %s1274_s25, 1 }
  0x17   : > { %s1685_s30 = smov (%p36_p0, %s35_s30), 0  ;;  %s1687_s5 = smov (!%p36_p0, %s38_s5), %s1274_s25 }
  0x18   : > { %1649 = sst [smem:[#allocation18_spill]] %s1685_s30  ;;  %s47_s9 = smul.u32 %s1270_s24, %s46_s7 }
  0x19   : > { %s59_s10 = sadd.s32 1, %s1254_s20  ;;  %p40_p1 = scmp.ge.s32.totalorder %s1687_s5, 2 }
  0x1a   : > { %p66_p2 = scmp.ne.s32.totalorder %s1254_s20, %s1250_s19  ;;  %s1397_s11 = sadd.s32 %s895_s8, %s47_s9 }
  0x1b   : > { %p67_p3 = scmp.eq.s32.totalorder %s1282_s27, 0  ;;  %s1689_s5 = smov (%p40_p1, %s1687_s5), 0 }
  0x1c   : > { %1650 = sst [smem:[#allocation19_spill]] %s1689_s5  ;;  %s1691_s6 = smov (!%p40_p1, %s42_s6), %s1278_s26 }
  0x1d   : > { %s50_s12 = ssub.s32 1, %s1689_s5  ;;  %s896_s13 = sshll.u32 %s1689_s5, 1 }
  0x1e   : > { %p44_p4 = scmp.ge.s32.totalorder %s1691_s6, 2  ;;  %s51_s14 = smul.u32 %s50_s12, %s1685_s30 }
  0x1f   : > { %p1406_p5 = por %p67_p3, %p66_p2  ;;  %p72_p6 = scmp.ne.s32.totalorder %s1250_s19, %s1246_s18 }
  0x20   : > { %s1693_s6 = smov (%p44_p4, %s1691_s6), 0  ;;  %s53_s8 = sadd.s32 %s896_s13, %s51_s14 }
  0x21   : > { %1652 = sst [smem:[#allocation20_spill]] %s1693_s6  ;;  %p73_p7 = scmp.eq.s32.totalorder %s893_s28, 0 }
  0x22   : > { %s54_s9 = ssub.s32 %s1278_s26, %s1693_s6  ;;  %s55_s29 = ssub.s32 %s1397_s11, %s53_s8 }
  0x23   : > { %s56_s12 = sor.u32 %s55_s29, %s54_s9  ;;  %p1419_p8 = por %p73_p7, %p72_p6 }
  0x24   : > { %p57_p9 = scmp.eq.s32.totalorder %s56_s12, 0  ;;  %s160_s18 = smul.u32 %s1270_s24, %s1274_s25 }
  0x25   : > { %s161_s23 = smul.u32 %s1689_s5, %s1685_s30  ;;  %s167_s13 = sadd.s32 1, %s1242_s17 }
  0x26   : > { %s1429_s14 = scalar_select %p57_p9, %s1254_s20, %s59_s10  }
  0x27   : > { %s163_s3 = ssub.s32 %s160_s18, %s161_s23  ;;  %p177_p10 = scmp.ne.s32.totalorder %s1242_s17, %s1238_s16 }
  0x28   : > { %s164_s8 = sor.u32 %s163_s3, %s54_s9  ;;  %p178_p11 = scmp.eq.s32.totalorder %s893_s28, 11 }
  0x29   : > { %p165_p12 = scmp.eq.s32.totalorder %s164_s8, 0  ;;  %p183_p13 = scmp.ne.s32.totalorder %s1238_s16, %s1234_s15 }
  0x2a   : > { %p1437_p0 = por %p178_p11, %p177_p10  ;;  %s1655_s12 = sadd.s32 4294967294, %s1282_s27  }
  0x2b   : > { %p184_p1 = scmp.eq.s32.totalorder %s1655_s12, 11  ;;  %p967_p3 = scmp.lt.s32.totalorder %s1282_s27, 12 }
  0x2c   : > { %s1654_s29 = scalar_select %p1437_p0, 1, 0 }
  0x2d   : > { %s1444_s6 = scalar_select %p165_p12, %s1242_s17, %s167_s13  }
  0x2e   : > { %p1446_p2 = por %p184_p1, %p183_p13  ;;  %s1452_s23 = sand.u32 1, %s1254_s20  }
  0x2f   : > { %s1639_s3 = sshll.u32 %s1452_s23, 2  ;;  %s947_s28 = smul.u32 3, %s1278_s26 }
  0x30   : > { %s1656_s10 = scalar_select %p1446_p2, 1, 0 }
  0x31   : > { %s214_s9 = scalar_lea.vmem [#allocation6], %s1639_s3  ;;  %p1460_p4 = pnand %p967_p3, %p1406_p5 }
  0x32   : > { %s227_s18 = sshll.u32 %s214_s9, 4  ;;  %s1465_s13 = sadd.s32 %s947_s28, %s1397_s11  ;;  %s228_s18 = int_to_ptr.vmem [resolvable:$true] %s227_s18 }
  0x33   : > { %s903_s12 = sshll.u32 %s1465_s13, 6  ;;  %s1658_s0 = sld [smem:[#allocation21_spill]] }
  0x34   : > { %s211_s26 = scalar_lea.sflag [#allocation7], %s1452_s23  ;;  %p1088_p5 = pneg %p1460_p4 }
  0x39   : > { %s225_s25 = scalar_lea.hbm %s1658_s0, %s903_s12  ;;  %s1091_s28 = scalar_lea.hbm %s1658_s0, 384 }
  0x3a   : > { %s1086_s3 = scalar_lea.hbm %s225_s25, 64 }
  0x3b   : > { %p1087_p7 = scmp.ne.s32.totalorder %s225_s25, %s1086_s3  ;;  %p1093_p11 = scmp.lt.s32.totalorder %s1091_s28, %s1086_s3 }
  0x3d   : > { %p1089_p9 = pnand %p1088_p5, %p1087_p7 }
  0x3f   : > { %p1090_p10 = pneg %p1089_p9 }
  0x41   : > { %p1095_p12 = pnand %p1093_p11, %p1090_p10 }
  0x43   : > { %1098 = shalt.err (!%p1095_p12)
}
  0x44   : > { %s1099_s9 = scalar_lea.vmem %s228_s18, 64  ;;  %s1284_s30 = smov [#allocation6]  }
  0x45   : > { %p1100_p13 = scmp.ne.s32.totalorder %s228_s18, %s1099_s9  ;;  %s1104_s5 = sshll.u32 %s1284_s30, 4  ;;  %s1105_s5 = int_to_ptr.vmem [resolvable:$false] %s1104_s5 }
  0x46   : > { %s1106_s13 = scalar_lea.vmem %s1105_s5, 128  ;;  %p1107_p7 = scmp.lt.s32.totalorder %s228_s18, %s1105_s5 }
  0x47   : > { %p1102_p1 = pnand %p1100_p13, %p1088_p5  ;;  %p1108_p9 = scmp.lt.s32.totalorder %s1106_s13, %s1099_s9 }
  0x49   : > { %p1103_p3 = pneg %p1102_p1  ;;  %p1109_p6 = por %p1108_p9, %p1107_p7 }
  0x4b   : > { %p1110_p2 = pnand %p1109_p6, %p1103_p3 }
  0x4d   : > { %1113 = shalt.err (!%p1110_p2)
}
  0x4e   : > { %959 = dma.hbm_to_vmem [thread:$0]  (!%p1460_p4), %s225_s25, 64, %s228_s18, %s211_s26  }
  0x4f   : > { %p256_p10 = scmp.lt.s32.totalorder %s1282_s27, 13  ;;  %s1659_s1 = sld [smem:[#allocation22_spill]] }
  0x50   : > { %p1660_p11 = scmp.ge.s32.totalorder %s1282_s27, 1  ;;  %s1662_s9 = sshll.u32 %s1452_s23, 2 }
  0x51   : > { %s238_s30 = scalar_lea.vmem [#allocation9], %s1662_s9  ;;  %s235_s13 = scalar_lea.sflag [#allocation10], %s1452_s23 }
  0x52   : > { %p1492_p12 = pnand %p1660_p11, %p256_p10  ;;  %s251_s5 = sshll.u32 %s238_s30, 4  ;;  %s252_s5 = int_to_ptr.vmem [resolvable:$true] %s251_s5 }
  0x55   : > { %s249_s11 = scalar_lea.hbm %s1659_s1, %s903_s12  ;;  %s1119_s18 = scalar_lea.hbm %s1659_s1, 384 }
  0x56   : > { %s1114_s0 = scalar_lea.hbm %s249_s11, 64 }
  0x57   : > { %p1115_p2 = scmp.ne.s32.totalorder %s249_s11, %s1114_s0  ;;  %p1121_p1 = scmp.lt.s32.totalorder %s1119_s18, %s1114_s0 }
  0x59   : > { %p1117_p6 = pnand %p1115_p2, %p1088_p5 }
  0x5b   : > { %p1118_p13 = pneg %p1117_p6 }
  0x5d   : > { %p1123_p3 = pnand %p1121_p1, %p1118_p13 }
  0x5f   : > { %1126 = shalt.err (!%p1123_p3)
}
  0x60   : > { %s1127_s12 = scalar_lea.vmem %s252_s5, 64  ;;  %s1285_s23 = smov [#allocation9]  }
  0x61   : > { %p1128_p7 = scmp.ne.s32.totalorder %s252_s5, %s1127_s12  ;;  %s1132_s3 = sshll.u32 %s1285_s23, 4  ;;  %s1133_s3 = int_to_ptr.vmem [resolvable:$false] %s1132_s3 }
  0x62   : > { %s1134_s7 = scalar_lea.vmem %s1133_s3, 128  ;;  %p1135_p11 = scmp.lt.s32.totalorder %s252_s5, %s1133_s3 }
  0x63   : > { %p1130_p9 = pnand %p1128_p7, %p1088_p5  ;;  %p1136_p2 = scmp.lt.s32.totalorder %s1134_s7, %s1127_s12 }
  0x65   : > { %p1131_p10 = pneg %p1130_p9  ;;  %p1137_p6 = por %p1136_p2, %p1135_p11 }
  0x67   : > { %p1138_p0 = pnand %p1137_p6, %p1131_p10 }
  0x69   : > { %1141 = shalt.err (!%p1138_p0)
}
  0x6a   : > { %962 = dma.hbm_to_vmem [thread:$0]  (!%p1460_p4), %s249_s11, 64, %s252_s5, %s235_s13  }
  0x6b   : > { %260 = sbr.rel (%p1492_p12) target bundleno = 1144 (0x478), region = 36  ;;  %s262_s0 = sand.u32 (!%p1492_p12), 1, %s1250_s19  }
  0x6c   : > { %s908_s9 = sshll.u32 (!%p1492_p12), %s262_s0, 2  ;;  %s263_s30 = scalar_lea.sflag (!%p1492_p12), [#allocation7], %s262_s0 }
  0x6d   : > { %s266_s25 = scalar_lea.vmem (!%p1492_p12), [#allocation6], %s908_s9 }
  0x70   : > { %1221 = dma.done.wait (%p1419_p8), %s263_s30, 64  }
  0x71   : > { %1223 = vsyncadd (%p1419_p8), %s263_s30, 4294967232  ;;  %s272_s26 = scalar_lea.sflag [#allocation10], %s262_s0  ;;  %s1517_s18 = scalar_lea.vmem [#allocation9], %s908_s9 }
  0x72   : > { %1225 = dma.done.wait (%p1419_p8), %s272_s26, 64  }
  0x73   : > { %1227 = vsyncadd (%p1419_p8), %s272_s26, 4294967232  ;;  %s302_s8 = sand.u32 1, %s1238_s16   ;;  %s1525_s11 = sshll.u32 %s1258_s21, 7 }
  0x74   : > { %s1529_s28 = sshll.u32 %s302_s8, 2  ;;  %p315_p0 = scmp.eq.s32.totalorder %s1262_s22, 0 }
  0x75   : > { %p316_p4 = scmp.eq.s32.totalorder %s1258_s21, 0  ;;  %s304_s5 = scalar_lea.vmem [#allocation11], %s1529_s28 }
  0x77   : > { %p317_p5 = pnand %p316_p4, %p315_p0 }
  0x79   : > { %320 = sbr.rel (%p317_p5) target bundleno = 128 (0x80), region = 48 }
  0x7e   : > { %vm321_vm0 = vcmask 24576   ;;  %v1286_v0 = vmov -inf  }
  0x7f   : > { %322 = vst.msk [vmem:[#allocation3] sm:$0x1] %vm321_vm0, %v1286_v0  ;;  %323 = vst.msk [vmem:[#allocation4] sm:$0x1] %vm321_vm0, %v1286_v0 }
  0x80 PF: > { %p912_p8 = scmp.ne.s32.totalorder %s1262_s22, 0 }
  0x81   : > { %s329_s4 = ssub.s32 (!%p912_p8), 324, %s1525_s11  ;;  %s477_s13 = sshra.s32 (!%p912_p8), %s1525_s11, 7 }
  0x82   : > { %326 = sbr.rel (%p912_p8) target bundleno = 428 (0x1ac), region = 52  ;;  %s913_s12 = sshll.u32 (!%p912_p8), %s477_s13, 2 }
  0x83   : > { %s480_s23 = scalar_lea.vmem (!%p912_p8), [#allocation2], %s913_s12 }
  0x87   : > { %v327_v1 = vlaneseq  ;;  %v330_v2 = vstv %s329_s4  ;;  %v332_v4 = vld [vmem:[%s266_s25] sm:$0xf]  ;;  %v334_v5 = vld [vmem:[%s1517_s18] sm:$0xf]  ;;  %vm337_vm1 = vcmask 1043456   ;;  %v1287_v10 = vmov 0  }
  0x88   : > { %1079 = vset.pattern.permute.xlu1 %v1287_v10  ;;  %1080 = vset.pattern.permute.xlu0 %v1287_v10  ;;  %v1288_v13 = vmov 1966171168   ;;  %v476_v43 = vld [vmem:[%s1517_s18] sm:$0xf]  ;;  %v336_v47 = vld [vmem:[#allocation3] sm:$0x1] }
  0x89   : > { %v328_v3 = vand.u32 127, %v327_v1  ;;  %v343_v11 = vshrl.u32 %v327_v1, 7  ;;  %v361_v14 = vunpack.c.l.s4 %v1288_v13  ;;  %481 = vst [vmem:[%s480_s23] sm:$0xf] %v476_v43  ;;  %vm405_vm3 = vcmask 24576   ;;  %v407_v53 = vld [vmem:[#allocation4] sm:$0x1] }
  0x8b   : > { %vm331_vm2 = vcmp.lt.s32.totalorder %v328_v3, %v330_v2  ;;  %v387_v12 = vsub.s32 %v328_v3, %v343_v11  ;;  %v344_v15 = vsub.s32 0, %v343_v11  ;;  %v348_v16 = vsub.s32 1, %v343_v11 }
  0x8c   : > { %v333_v6 = vsel %vm331_vm2, %v332_v4, -inf  ;;  %v335_v7 = vsel %vm331_vm2, %v334_v5, -inf  ;;  %v352_v17 = vsub.s32 2, %v343_v11  ;;  %v356_v18 = vsub.s32 3, %v343_v11 }
  0x8d   : > { %v338_v8 = vsel %vm337_vm1, %v333_v6, -inf  ;;  %v408_v9 = vsel %vm337_vm1, %v335_v7, -inf  ;;  %v362_v19 = vunpack.c.0.s8 %v361_v14 }
  0x8e   : > { %339 = vmax.xlane.f32.xlu0 %v338_v8 }
  0x8f   : > { %v365_v25 = vsub.s32 %v362_v19, %v343_v11 }
  0x92   : > { %409 = vmax.xlane.f32.xlu0 %v408_v9 }
 0x117   : > { %v340_v20 = vpop.xlane.xlu0 %339 }
 0x118   : > { %v345_v21 = vrot.slane %v340_v20, %v344_v15  ;;  %v349_v22 = vrot.slane %v340_v20, %v348_v16  ;;  %v353_v23 = vrot.slane %v340_v20, %v352_v17  ;;  %v357_v24 = vrot.slane %v340_v20, %v356_v18 }
 0x11a   : > { %v358_v26 = vcombine.low %v345_v21, %v349_v22  ;;  %v359_v27 = vcombine.low %v353_v23, %v357_v24 }
 0x11b   : > { %v410_v28 = vpop.xlane.xlu0 %409 }
 0x11c   : > { %v415_v29 = vrot.slane %v410_v28, %v344_v15  ;;  %v419_v30 = vrot.slane %v410_v28, %v348_v16  ;;  %v423_v31 = vrot.slane %v410_v28, %v352_v17  ;;  %v427_v32 = vrot.slane %v410_v28, %v356_v18 }
 0x11d   : > { %v366_v33 = vrot.slane %v358_v26, %v365_v25  ;;  %v373_v34 = vrot.slane %v359_v27, %v365_v25 }
 0x11e   : > { %v428_v35 = vcombine.low %v415_v29, %v419_v30  ;;  %v429_v36 = vcombine.low %v423_v31, %v427_v32 }
 0x11f   : > { %v374_v37 = vcombine.low %v366_v33, %v373_v34 }
 0x120   : > { %v436_v38 = vrot.slane %v428_v35, %v365_v25  ;;  %v443_v39 = vrot.slane %v429_v36, %v365_v25 }
 0x121   : > { %v381_v40 = vrot.slane %v374_v37, %v365_v25 }
 0x122   : > { %v444_v41 = vcombine.low %v436_v38, %v443_v39 }
 0x123   : > { %383 = vperm.xlu1 %1079, %v381_v40  }
 0x124   : > { %v451_v42 = vrot.slane %v444_v41, %v365_v25 }
 0x127   : > { %453 = vperm.xlu1 %1079, %v451_v42  }
 0x19e   : > { %v384_v44 = vpop.permute.xlu1 %383 }
 0x19f   : > { %v388_v45 = vrot.slane %v384_v44, %v387_v12 }
 0x1a1   : > { %v395_v46 = vrot.slane %v388_v45, %v365_v25 }
 0x1a2   : > { %v454_v48 = vpop.permute.xlu1 %453 }
 0x1a3   : > { %v402_v49 = vrot.slane %v395_v46, %v365_v25  ;;  %v458_v50 = vrot.slane %v454_v48, %v387_v12 }
 0x1a5   : > { %v404_v51 = vmax.f32 %v336_v47, %v402_v49  ;;  %v465_v52 = vrot.slane %v458_v50, %v365_v25 }
 0x1a7   : > { %406 = vst.msk [vmem:[#allocation3] sm:$0x1] %vm405_vm3, %v404_v51  ;;  %v472_v54 = vrot.slane %v465_v52, %v365_v25 }
 0x1a9   : > { %v474_v55 = vmax.f32 %v407_v53, %v472_v54 }
 0x1ab   : > { %475 = vst.msk [vmem:[#allocation4] sm:$0x1] %vm405_vm3, %v474_v55 }
 0x1ac PF: > { %p482_p12 = scmp.eq.s32.totalorder %s1262_s22, 1 }
 0x1ae   : > { %p483_p13 = pnand %p482_p12, %p316_p4 }
 0x1af   : > { %s1663_s2 = sld [smem:[#allocation23_spill]] (!%p483_p13) }
 0x1b0   : > { %486 = sbr.rel (%p483_p13) target bundleno = 981 (0x3d5), region = 56  ;;  %s1664_s26 = sld [smem:[#allocation24_spill]] (!%p483_p13) }
 0x1b5   : > { %v490_v56 = vld [vmem:[%s1663_s2 + $0x4] sm:$0xf]  ;;  %vm495_vm4 = vcmask 1043456   ;;  %vm491_vm5 = vcmask 31744   ;;  %v1289_v57 = vmov 0.0   ;;  %vm1290_vm6 = vmmov 0  }
 0x1b6   : > { %932 = vmatprep.subr.mxu0 %v1289_v57  ;;  %937 = vmatprep.subr.mxu1 %v1289_v57  ;;  %v488_v58 = vld [vmem:[%s1663_s2] sm:$0xf]  ;;  %v489_v59 = vld [vmem:[#allocation4] sm:$0x1]  ;;  %v487_v60 = vld [vmem:[#allocation3] sm:$0x1]  ;;  %v727_v9 = vlaneseq }
 0x1b7   : > { %933 = vmatpush3.msk.msra.mxu0 %vm495_vm4, %v490_v56  ;;  %934 = vmatprep.mubr.msk.f32.mxu0 %vm1290_vm6, %v1289_v57  ;;  %v646_v61 = vld [vmem:[%s1664_s26] sm:$0xff]  ;;  %vm647_vm7 = vcmask 64512   ;;  %vm734_vm8 = vcmask 3072  }
 0x1b8   : > { %938 = vmatpush3.msk.msra.mxu1 %vm495_vm4, %v488_v58  ;;  %939 = vmatprep.mubr.msk.f32.mxu1 %vm1290_vm6, %v1289_v57  ;;  %v728_v10 = vshrl.u32 %v727_v9, 7 }
 0x1b9   : > { %935 = vmatmul.mubr.msk.f32.vlgmr.msra.gmra.mxu0 %vm491_vm5, %v489_v59  ;;  %940 = vmatmul.mubr.msk.f32.vlgmr.msra.gmra.mxu1 %vm491_vm5, %v487_v60 }
 0x1ba   : > { %942 = vmatprep.subr.mxu0 %v1289_v57  ;;  %944 = vmatprep.mubr.msk.f32.mxu0 %vm1290_vm6, %v1289_v57  ;;  %v729_v11 = vsub.s32 0, %v728_v10 }
 0x1bb   : > { %943 = vmatpush3.msra.mxu0 %v646_v61 }
 0x279   : > { %v565_v62 = vpop.f32.mrf.mxu0  ;;  %v641_v63 = vpop.f32.mrf.mxu1 }
 0x27a   : > { %v642_v0 = vadd.f32 %v641_v63, %v565_v62 }
 0x27b   : > { %v936_v1 = vpop.f32.mrf.mxu0  ;;  %v941_v2 = vpop.f32.mrf.mxu1 }
 0x27c   : > { %v645_v3 = vmax.f32 %v642_v0, 0.0 }
 0x27e   : > { %945 = vmatmul.mubr.msk.f32.vlgmr.msra.gmra.mxu0 %vm647_vm7, %v645_v3 }
 0x33e   : > { %v717_v4 = vpop.f32.mrf.mxu0 }
 0x33f   : > { %v919_v5 = vmul.f32 -1.442695, %v717_v4 }
 0x340   : > { %v946_v6 = vpop.f32.mrf.mxu0 }
 0x341   : > { %1081 = vpow2.f32 %v919_v5 }
 0x34e   : > { %v1082_v7 = vpop.eup %1081 }
 0x34f   : > { %v724_v8 = vadd.f32 1.0, %v1082_v7 }
 0x351   : > { %1083 = vrcp.f32 %v724_v8 }
 0x35e   : > { %v1084_v12 = vpop.eup %1083 }
 0x35f   : > { %v730_v13 = vrot.slane %v1084_v12, %v729_v11 }
 0x361   : > { %732 = vbcast.lane.b32.xlu0 %v730_v13, 256 }
 0x3d3   : > { %v733_v14 = vpop.permute.xlu0 %732 }
 0x3d4   : > { %735 = vst.msk [vmem:[#allocation5] sm:$0xf] %vm734_vm8, %v733_v14 }
 0x3d5 PF: > { %p920_p1 = scmp.ne.s32.totalorder %s1262_s22, 1 }
 0x3d6   : > { %s739_s18 = sshra.s32 (!%p920_p1), %s1525_s11, 7 }
 0x3d7   : > { %738 = sbr.rel (%p920_p1) target bundleno = 1117 (0x45d), region = 60  ;;  %s921_s4 = sshll.u32 (!%p920_p1), %s739_s18, 2 }
 0x3d8   : > { %s742_s13 = scalar_lea.vmem (!%p920_p1), [#allocation2], %s921_s4 }
 0x3dc   : > { %v744_v15 = vld [vmem:[#allocation5] sm:$0xf]  ;;  %v1291_v16 = vmov 0   ;;  %v743_v17 = vld [vmem:[%s742_s13] sm:$0xf] }
 0x3dd   : > { %1085 = vset.pattern.permute.xlu0 %v1291_v16 }
 0x3de   : > { %747 = vperm.xlu0 %1085, %v744_v15  }
 0x459   : > { %v748_v18 = vpop.permute.xlu0 %747 }
 0x45a   : > { %v750_v19 = vmul.f32 %v748_v18, %v743_v17 }
 0x45c   : > { %751 = vst [vmem:[%s304_s5] sm:$0xf] %v750_v19 }
 0x45d PF: > { %s1665_s12 = sld [smem:[#allocation15_spill]]  ;;  %s760_s23 = smul.u32 %s1258_s21, %s1262_s22 }
 0x45e   : > { %s769_s7 = sshll.u32 %s304_s5, 4  ;;  %s1666_s25 = sld [smem:[#allocation25_spill]]  ;;  %s770_s7 = int_to_ptr.vmem [resolvable:$true] %s769_s7 }
 0x45f   : > { %s753_s18 = scalar_lea.sflag [#allocation8], %s302_s8  ;;  %s1142_s13 = scalar_lea.vmem %s770_s7, 64 }
 0x460   : > { %p1143_p3 = scmp.ne.s32.totalorder %s770_s7, %s1142_s13  ;;  %p1668_p7 = scmp.ne.s32.totalorder %s1654_s29, 0 }
 0x461   : > { %s1292_s1 = smov [#allocation11]  }
 0x462   : > { %p1144_p9 = pnand %p1143_p3, %p1668_p7  ;;  %s1146_s2 = sshll.u32 %s1292_s1, 4  ;;  %s1147_s2 = int_to_ptr.vmem [resolvable:$false] %s1146_s2 }
 0x463   : > { %s949_s3 = smul.u32 3, %s1665_s12  ;;  %s1148_s21 = scalar_lea.vmem %s1147_s2, 128 }
 0x464   : > { %s1667_s4 = smov %s1666_s25  ;;  %p1145_p10 = pneg %p1144_p9 }
 0x465   : > { %s765_s0 = sadd.s32 %s949_s3, %s760_s23  ;;  %p1149_p11 = scmp.lt.s32.totalorder %s770_s7, %s1147_s2 }
 0x466   : > { %s923_s11 = sshll.u32 %s765_s0, 6  ;;  %p1150_p2 = scmp.lt.s32.totalorder %s1148_s21, %s1142_s13 }
 0x467   : > { %s767_s26 = scalar_lea.hbm %s1666_s25, %s923_s11 }
 0x468   : > { %p1151_p6 = por %p1150_p2, %p1149_p11 }
 0x46a   : > { %p1152_p0 = pnand %p1151_p6, %p1145_p10 }
 0x46c   : > { %1155 = shalt.err (!%p1152_p0)
}
 0x46d   : > { %s1156_s22 = scalar_lea.hbm %s767_s26, 64  ;;  %s1160_s5 = scalar_lea.hbm %s1667_s4, 384 }
 0x46e   : > { %p1157_p4 = scmp.ne.s32.totalorder %s767_s26, %s1156_s22  ;;  %p1161_p12 = scmp.lt.s32.totalorder %s767_s26, %s1667_s4 }
 0x46f   : > { %p1162_p13 = scmp.lt.s32.totalorder %s1160_s5, %s1156_s22 }
 0x470   : > { %p1158_p5 = pnand %p1157_p4, %p1668_p7 }
 0x471   : > { %p1163_p1 = por %p1162_p13, %p1161_p12 }
 0x472   : > { %p1159_p8 = pneg %p1158_p5 }
 0x474   : > { %p1164_p3 = pnand %p1163_p1, %p1159_p8 }
 0x476   : > { %1167 = shalt.err (!%p1164_p3)
}
 0x477   : > { %954 = dma.vmem_to_hbm [thread:$0]  (%p1668_p7), %s770_s7, 64, %s767_s26, %s753_s18  }
 0x478 PF: > { %p968_p9 = scmp.ge.s32.totalorder %s1282_s27, 2  ;;  %s781_s1 = sand.u32 1, %s1234_s15  }
 0x479   : > { %p1669_p10 = scmp.ne.s32.totalorder %s1656_s10, 0  ;;  %s782_s2 = scalar_lea.sflag [#allocation8], %s781_s1 }
 0x47b   : > { %p964_p11 = pnand %p968_p9, %p1669_p10 }
 0x47d   : > { %p965_p2 = pneg %p964_p11 }
 0x47f   : > { %1229 = dma.done.wait (%p965_p2), %s782_s2, 64  }
 0x480   : > { %1231 = vsyncadd (%p965_p2), %s782_s2, 4294967232  ;;  %s23_s27 = sadd.s32 1, %s1282_s27   ;;  %s1671_s22 = sld [smem:[#allocation16_spill]] }
 0x481   : > { %p1584_p6 = scmp.ge.s32.totalorder %s23_s27, 14   ;;  %s1672_s23 = sld [smem:[#allocation17_spill]] }
 0x482   : > { %s1673_s29 = sld [smem:[#allocation18_spill]]  ;;  %s1676_s15 = smov %s1238_s16 }
 0x483   : > { %s1674_s25 = sld [smem:[#allocation19_spill]]  ;;  %s1677_s16 = smov %s1242_s17 }
 0x484   : > { %s1675_s26 = sld [smem:[#allocation20_spill]]  ;;  %s1678_s17 = smov %s1444_s6 }
 0x485   : > { %s1679_s18 = smov %s1250_s19  ;;  %s1680_s19 = smov %s1254_s20 }
 0x486   : > { %s1681_s20 = smov %s1429_s14  ;;  %s1682_s21 = smov %s1270_s24 }
 0x487   :  { %22 = sbr.rel (!%p1584_p6) target bundleno = 18 (0x12), region = 112 }
 0x488   : > { %s1683_s24 = smov %s1673_s29 }
 0x48c   :  { %787 = vsyncpa [#allocation7], 1 }
 0x48d   :  { %789 = vsyncpa [#allocation7 + $0x1], 1 }
 0x48e   :  { %790 = vsyncpa [#allocation10], 1 }
 0x48f   :  { %792 = vsyncpa [#allocation10 + $0x1], 1 }
 0x490   :  { %793 = vsyncpa [#allocation8], 1 }
 0x491   :  { %795 = vsyncpa [#allocation8 + $0x1], 1 }

</bundles_post_ra>
